<compile_context>
chip_gen: v5e
topology: v5e:2x2
jax: 0.10.0
libtpu: 0.0.40
codegen_flags: <defaults>
</compile_context>

<pallas_src>
import jax
import jax.numpy as jnp
from jax import lax
from jax.experimental import pallas as pl
from jax.experimental.pallas import tpu as pltpu


def _round_up(x, m):
    return (x + m - 1) // m * m


def _make_rpn_kernel(fg_lo, fg_hi):
    """Fused: conv1 (as im2col matmul) + bias + ReLU, fused 1x1 heads, fg sigmoid."""

    def kernel(xcol_ref, w1_ref, b1_ref, wh_ref, bh_ref, out_ref):
        # xcol_ref : (1, TH*Wp, Kp)   bf16  im2col'ed feature row-band
        # w1_ref   : (Kp, Cmid_p)     bf16  3x3 conv weight, im2col layout
        # b1_ref   : (1, Cmid_p)      f32
        # wh_ref   : (Cmid_p, COUT)   bf16  fused [loc | score | fg-diff] head
        # bh_ref   : (1, COUT)        f32
        # out_ref  : (1, TH*Wp, COUT) f32   lane-dense combined output
        x = xcol_ref[0]                                    # (TH*Wp, Kp), free view
        hidden = jnp.dot(x, w1_ref[...],
                         preferred_element_type=jnp.float32)
        hidden = jnp.maximum(hidden + b1_ref[...], 0.0)    # conv1 + ReLU in f32
        heads = jnp.dot(hidden.astype(jnp.bfloat16), wh_ref[...],
                        preferred_element_type=jnp.float32) + bh_ref[...]
        # fg score == softmax([bg, fg])[1] == sigmoid(fg - bg); the (fg - bg)
        # logit already sits in lanes [fg_lo, fg_hi) thanks to the fused head
        # weight, so only a (cheap, EUP-slot) sigmoid + select is needed.
        lane = lax.broadcasted_iota(jnp.int32, heads.shape, 1)
        sig = 1.0 / (1.0 + jnp.exp(-heads))
        out = jnp.where((lane >= fg_lo) & (lane < fg_hi), sig, heads)
        out_ref[0] = out

    return kernel


def rpn_forward(features_nchw, params, row_tile=None):
    """Forward pass matching RegionProposalNetwork.forward (inference path).

    Returns (rpn_locs, rpn_scores, rpn_fg_scores) with PyTorch conventions:
      rpn_locs      : (n, H*W*A, 4)
      rpn_scores    : (n, H*W*A, 2)
      rpn_fg_scores : (n, H*W*A)
    """
    n, Cin, H, W = features_nchw.shape
    Cmid = params["w1"].shape[0]
    A = int(params["n_anchor"])

    # ---- padded / lane-aligned sizes ---------------------------------------
    Wp = _round_up(W, 16)                 # sublane-friendly spatial width
    K = 9 * Cin
    Kp = _round_up(K, 128)                # lane-aligned im2col contraction
    Cmid_p = _round_up(Cmid, 128)         # lane-aligned hidden width
    n_out = 7 * A                         # 4A loc + 2A score + A fg-logit
    COUT = _round_up(n_out, 128)          # lane-dense output channels

    # Row-band tile: biggest band whose bf16 im2col block stays ~<= 4 MiB
    # (keeps per-step VMEM well under v5e's 16 MiB / v7x's 32 MiB scoped).
    if row_tile is None:
        budget = 4 * 1024 * 1024
        row_tile = max(1, budget // (Wp * Kp * 2))
    TH = max(1, min(int(row_tile), H))
    Hp = _round_up(H, TH)

    # ---- im2col (both ky and kx) in plain XLA ------------------------------
    x = jnp.transpose(features_nchw, (0, 2, 3, 1)).astype(jnp.float32)
    xpad = jnp.pad(x, ((0, 0), (1, 1), (1, 1), (0, 0)))
    taps = [xpad[:, ky:ky + H, kx:kx + W, :]
            for ky in range(3) for kx in range(3)]
    xcol = jnp.concatenate(taps, axis=-1)                       # (n,H,W,9Cin)
    xcol = jnp.pad(xcol, ((0, 0), (0, Hp - H), (0, Wp - W), (0, Kp - K)))
    xcol = xcol.reshape(n, Hp * Wp, Kp).astype(jnp.bfloat16)

    # ---- weights: im2col conv1 + fused heads (bf16), biases in f32 ---------
    w1 = jnp.transpose(params["w1"], (2, 3, 1, 0)).reshape(K, Cmid)
    w1 = jnp.pad(w1, ((0, Kp - K), (0, Cmid_p - Cmid))).astype(jnp.bfloat16)
    b1 = jnp.pad(params["b1"], (0, Cmid_p - Cmid)).reshape(1, Cmid_p)
    b1 = b1.astype(jnp.float32)

    wl = params["wl"][:, :, 0, 0]              # (4A, Cmid)
    ws = params["ws"][:, :, 0, 0]              # (2A, Cmid)
    wfg = ws[1::2] - ws[0::2]                  # (A, Cmid): fg - bg logit weight
    wh = jnp.concatenate([wl, ws, wfg], axis=0).T                 # (Cmid, 7A)
    wh = jnp.pad(wh, ((0, Cmid_p - Cmid), (0, COUT - n_out)))
    wh = wh.astype(jnp.bfloat16)
    bfg = params["bs"][1::2] - params["bs"][0::2]
    bh = jnp.concatenate([params["bl"], params["bs"], bfg], axis=0)
    bh = jnp.pad(bh, (0, COUT - n_out)).reshape(1, COUT).astype(jnp.float32)

    # ---- pallas call --------------------------------------------------------
    kernel = _make_rpn_kernel(6 * A, 7 * A)
    grid = (n, Hp // TH)
    flops = 2 * n * Hp * Wp * (Kp * Cmid_p + Cmid_p * COUT)
    bytes_accessed = (xcol.size * 2 + w1.size * 2 + wh.size * 2
                      + (b1.size + bh.size) * 4 + n * Hp * Wp * COUT * 4)

    out = pl.pallas_call(
        kernel,
        out_shape=jax.ShapeDtypeStruct((n, Hp * Wp, COUT), jnp.float32),
        grid_spec=pltpu.PrefetchScalarGridSpec(
            num_scalar_prefetch=0,
            grid=grid,
            in_specs=[
                pl.BlockSpec((1, TH * Wp, Kp), lambda b, i: (b, i, 0)),
                # Constant index maps -> weights stay resident (no per-step DMA).
                pl.BlockSpec((Kp, Cmid_p), lambda b, i: (0, 0)),
                pl.BlockSpec((1, Cmid_p), lambda b, i: (0, 0)),
                pl.BlockSpec((Cmid_p, COUT), lambda b, i: (0, 0)),
                pl.BlockSpec((1, COUT), lambda b, i: (0, 0)),
            ],
            out_specs=pl.BlockSpec((1, TH * Wp, COUT), lambda b, i: (b, i, 0)),
        ),
        compiler_params=pltpu.CompilerParams(
            dimension_semantics=("parallel", "parallel"),
            vmem_limit_bytes=32 * 1024 * 1024),
        cost_estimate=pl.CostEstimate(
            flops=int(flops),
            transcendentals=int(n * Hp * Wp * COUT),
            bytes_accessed=int(bytes_accessed)),
    )(xcol, w1, b1, wh, bh)

    # ---- un-pad / reshape to PyTorch conventions (outside the kernel) ------
    out = out.reshape(n, Hp, Wp, COUT)[:, :H, :W, :]
    rpn_locs = out[..., 0:4 * A].reshape(n, -1, 4)
    rpn_scores = out[..., 4 * A:6 * A].reshape(n, -1, 2)
    rpn_fg_scores = out[..., 6 * A:7 * A].reshape(n, -1)

    # TODO(synk): anchor_generator / proposal_layer (box decode + NMS) are
    # externally injected torch modules with no Pallas equivalent here.
    # TODO(synk): training-mode losses (anchor_target_creator, smooth-L1,
    # cross-entropy with ignore_index=-1) are not implemented.
    return rpn_locs, rpn_scores, rpn_fg_scores


def _reference_forward(features_nchw, params):
    """Pure-JAX reference (lax.conv, f32) for correctness checking."""
    x = jnp.transpose(features_nchw, (0, 2, 3, 1)).astype(jnp.float32)
    w1 = jnp.transpose(params["w1"], (2, 3, 1, 0))
    h = lax.conv_general_dilated(
        x, w1, window_strides=(1, 1), padding="SAME",
        dimension_numbers=("NHWC", "HWIO", "NHWC")) + params["b1"]
    h = jnp.maximum(h, 0.0)
    ws = jnp.transpose(params["ws"][:, :, 0, 0], (1, 0))
    wl = jnp.transpose(params["wl"][:, :, 0, 0], (1, 0))
    score = jnp.einsum("nhwc,co->nhwo", h, ws) + params["bs"]
    loc = jnp.einsum("nhwc,co->nhwo", h, wl) + params["bl"]
    n = features_nchw.shape[0]
    rpn_locs = loc.reshape(n, -1, 4)
    rpn_scores = score.reshape(n, -1, 2)
    fg = jax.nn.softmax(rpn_scores, axis=-1)[:, :, 1].reshape(n, -1)
    return rpn_locs, rpn_scores, fg


def init_params(key, in_channels, mid_channels, n_anchor):
    """Deterministic synthetic parameters (PyTorch Conv2d weight layouts)."""
    k1, k2, k3, k4, k5, k6 = jax.random.split(key, 6)
    scale = 0.05
    return {
        "n_anchor": n_anchor,
        "w1": scale * jax.random.normal(k1, (mid_channels, in_channels, 3, 3),
                                        jnp.float32),
        "b1": scale * jax.random.normal(k2, (mid_channels,), jnp.float32),
        "ws": scale * jax.random.normal(k3, (n_anchor * 2, mid_channels, 1, 1),
                                        jnp.float32),
        "bs": scale * jax.random.normal(k4, (n_anchor * 2,), jnp.float32),
        "wl": scale * jax.random.normal(k5, (n_anchor * 4, mid_channels, 1, 1),
                                        jnp.float32),
        "bl": scale * jax.random.normal(k6, (n_anchor * 4,), jnp.float32),
    }


if __name__ == "__main__":
    # Small shapes consistent with the module's forward:
    # features: (n, in_channels, h, w) in NCHW.
    n, in_channels, mid_channels, H, W = 2, 32, 32, 16, 16
    n_anchor = 3

    key = jax.random.PRNGKey(0)
    pkey, xkey = jax.random.split(key)
    params = init_params(pkey, in_channels, mid_channels, n_anchor)
    features = jax.random.normal(xkey, (n, in_channels, H, W), jnp.float32)

    # row_tile=8 -> grid (2 batches x 2 row-bands): exercises the spatial axis.
    locs, scores, fg_scores = rpn_forward(features, params, row_tile=8)
    jax.block_until_ready((locs, scores, fg_scores))

    # Shape checks against PyTorch semantics.
    assert locs.shape == (n, H * W * n_anchor, 4)
    assert scores.shape == (n, H * W * n_anchor, 2)
    assert fg_scores.shape == (n, H * W * n_anchor)

    # Numerical check against pure-JAX f32 reference (kernel matmuls are bf16).
    r_locs, r_scores, r_fg = _reference_forward(features, params)
    assert jnp.allclose(locs, r_locs, rtol=3e-2, atol=3e-2)
    assert jnp.allclose(scores, r_scores, rtol=3e-2, atol=3e-2)
    assert jnp.allclose(fg_scores, r_fg, rtol=3e-2, atol=3e-2)

    print("KERNEL_OK")
</pallas_src>

<mosaic_0001>
module attributes {stable_mosaic.version = 11 : i64} {
  func.func @kernel(%arg0: i32, %arg1: i32, %arg2: memref<1x128x384xbf16, #tpu.memory_space<vmem>>, %arg3: memref<384x128xbf16, #tpu.memory_space<vmem>>, %arg4: memref<1x128xf32, #tpu.memory_space<vmem>>, %arg5: memref<128x128xbf16, #tpu.memory_space<vmem>>, %arg6: memref<1x128xf32, #tpu.memory_space<vmem>>, %arg7: memref<1x128x128xf32, #tpu.memory_space<vmem>>) attributes {dimension_semantics = [#tpu.dimension_semantics<parallel>, #tpu.dimension_semantics<parallel>], iteration_bounds = array<i64: 2, 2>, scalar_prefetch = 0 : i64, scratch_operands = 0 : i64, tpu.core_type = #tpu.core_type<tc>, window_params = [{transform_indices = @transform_0, window_bounds = array<i64: 1, 128, 384>}, {pipeline_mode = #tpu.pipeline_mode<synchronous>, transform_indices = @transform_1, window_bounds = array<i64: 384, 128>}, {pipeline_mode = #tpu.pipeline_mode<synchronous>, transform_indices = @transform_2, window_bounds = array<i64: 1, 128>}, {pipeline_mode = #tpu.pipeline_mode<synchronous>, transform_indices = @transform_3, window_bounds = array<i64: 128, 128>}, {pipeline_mode = #tpu.pipeline_mode<synchronous>, transform_indices = @transform_4, window_bounds = array<i64: 1, 128>}, {transform_indices = @transform_5, window_bounds = array<i64: 1, 128, 128>}]} {
    %c0 = arith.constant 0 : index
    %c0_0 = arith.constant 0 : index
    %c0_1 = arith.constant 0 : index
    %0 = vector.load %arg2[%c0, %c0_0, %c0_1] : memref<1x128x384xbf16, #tpu.memory_space<vmem>>, vector<1x128x384xbf16>
    %1 = vector.shape_cast %0 : vector<1x128x384xbf16> to vector<128x384xbf16>
    %c0_2 = arith.constant 0 : index
    %c0_3 = arith.constant 0 : index
    %2 = vector.load %arg3[%c0_2, %c0_3] : memref<384x128xbf16, #tpu.memory_space<vmem>>, vector<384x128xbf16>
    %cst = arith.constant dense<0.000000e+00> : vector<128x128xf32>
    %3 = tpu.matmul %1, %2, %cst {dimension_numbers = #tpu.dot_dimension_numbers<[1], [0], [0], [1], [0, 0, 1, 1], [], []>} : vector<128x384xbf16>, vector<384x128xbf16>, vector<128x128xf32> -> vector<128x128xf32>
    %c0_4 = arith.constant 0 : index
    %c0_5 = arith.constant 0 : index
    %4 = vector.load %arg4[%c0_4, %c0_5] : memref<1x128xf32, #tpu.memory_space<vmem>>, vector<1x128xf32>
    %5 = vector.broadcast %4 : vector<1x128xf32> to vector<128x128xf32>
    %6 = arith.addf %3, %5 : vector<128x128xf32>
    %cst_6 = arith.constant 0.000000e+00 : f32
    %7 = vector.broadcast %cst_6 : f32 to vector<128x128xf32>
    %8 = arith.maximumf %6, %7 : vector<128x128xf32>
    %9 = arith.truncf %8 : vector<128x128xf32> to vector<128x128xbf16>
    %c0_7 = arith.constant 0 : index
    %c0_8 = arith.constant 0 : index
    %10 = vector.load %arg5[%c0_7, %c0_8] : memref<128x128xbf16, #tpu.memory_space<vmem>>, vector<128x128xbf16>
    %cst_9 = arith.constant dense<0.000000e+00> : vector<128x128xf32>
    %11 = tpu.matmul %9, %10, %cst_9 {dimension_numbers = #tpu.dot_dimension_numbers<[1], [0], [0], [1], [0, 0, 1, 1], [], []>} : vector<128x128xbf16>, vector<128x128xbf16>, vector<128x128xf32> -> vector<128x128xf32>
    %c0_10 = arith.constant 0 : index
    %c0_11 = arith.constant 0 : index
    %12 = vector.load %arg6[%c0_10, %c0_11] : memref<1x128xf32, #tpu.memory_space<vmem>>, vector<1x128xf32>
    %13 = vector.broadcast %12 : vector<1x128xf32> to vector<128x128xf32>
    %14 = arith.addf %11, %13 : vector<128x128xf32>
    %15 = tpu.iota {dimensions = array<i32: 1>} : vector<128x128xi32>
    %cst_12 = arith.constant 0.000000e+00 : f32
    %16 = vector.broadcast %cst_12 : f32 to vector<128x128xf32>
    %17 = arith.subf %16, %14 : vector<128x128xf32>
    %18 = math.exp %17 : vector<128x128xf32>
    %cst_13 = arith.constant 1.000000e+00 : f32
    %19 = vector.broadcast %cst_13 : f32 to vector<128x128xf32>
    %20 = arith.addf %19, %18 : vector<128x128xf32>
    %cst_14 = arith.constant 1.000000e+00 : f32
    %21 = vector.broadcast %cst_14 : f32 to vector<128x128xf32>
    %22 = arith.divf %21, %20 : vector<128x128xf32>
    %c18_i32 = arith.constant 18 : i32
    %23 = vector.broadcast %c18_i32 : i32 to vector<128x128xi32>
    %24 = arith.cmpi sge, %15, %23 : vector<128x128xi32>
    %c21_i32 = arith.constant 21 : i32
    %25 = vector.broadcast %c21_i32 : i32 to vector<128x128xi32>
    %26 = arith.cmpi slt, %15, %25 : vector<128x128xi32>
    %27 = arith.andi %24, %26 : vector<128x128xi1>
    %28 = arith.select %27, %22, %14 : vector<128x128xi1>, vector<128x128xf32>
    %c0_15 = arith.constant 0 : index
    %c0_16 = arith.constant 0 : index
    %c0_17 = arith.constant 0 : index
    %29 = vector.load %arg7[%c0_15, %c0_16, %c0_17] : memref<1x128x128xf32, #tpu.memory_space<vmem>>, vector<1x128x128xf32>
    %30 = vector.shape_cast %29 : vector<1x128x128xf32> to vector<128x128xf32>
    %31 = vector.shape_cast %28 : vector<128x128xf32> to vector<1x128x128xf32>
    tpu.vector_store %arg7[%c0_15, %c0_16, %c0_17], %31 {strides = array<i32>} : memref<1x128x128xf32, #tpu.memory_space<vmem>>, vector<1x128x128xf32>,
    return
  }
  func.func @transform_0(%arg0: i32, %arg1: i32) -> (i32, i32, i32) {
    %c0_i32 = arith.constant 0 : i32
    %c0_i32_0 = arith.constant 0 : i32
    return %arg0, %arg1, %c0_i32 : i32, i32, i32
  }
  func.func @transform_1(%arg0: i32, %arg1: i32) -> (i32, i32) {
    %c0_i32 = arith.constant 0 : i32
    %c0_i32_0 = arith.constant 0 : i32
    %c0_i32_1 = arith.constant 0 : i32
    return %c0_i32, %c0_i32_0 : i32, i32
  }
  func.func @transform_2(%arg0: i32, %arg1: i32) -> (i32, i32) {
    %c0_i32 = arith.constant 0 : i32
    %c0_i32_0 = arith.constant 0 : i32
    %c0_i32_1 = arith.constant 0 : i32
    return %c0_i32, %c0_i32_0 : i32, i32
  }
  func.func @transform_3(%arg0: i32, %arg1: i32) -> (i32, i32) {
    %c0_i32 = arith.constant 0 : i32
    %c0_i32_0 = arith.constant 0 : i32
    %c0_i32_1 = arith.constant 0 : i32
    return %c0_i32, %c0_i32_0 : i32, i32
  }
  func.func @transform_4(%arg0: i32, %arg1: i32) -> (i32, i32) {
    %c0_i32 = arith.constant 0 : i32
    %c0_i32_0 = arith.constant 0 : i32
    %c0_i32_1 = arith.constant 0 : i32
    return %c0_i32, %c0_i32_0 : i32, i32
  }
  func.func @transform_5(%arg0: i32, %arg1: i32) -> (i32, i32, i32) {
    %c0_i32 = arith.constant 0 : i32
    %c0_i32_0 = arith.constant 0 : i32
    return %arg0, %arg1, %c0_i32 : i32, i32, i32
  }
}

</mosaic_0001>

<bundles_post_ra>
// kernel: tpu_custom_call.1
= control target key start
LH: loop header
LB: loop body
LE: loop exit
PB: predicated region body
PF: predicated region fallthrough
CT: control target
= control target key end

     0   :  { %s2499_s0 = inlined_call_operand.hbm [shape: bf16[2,256,384], index: 0, kind: input, shape index: {}]   ;;  %s2500_s1 = inlined_call_operand.hbm [shape: bf16[384,128], index: 1, kind: input, shape index: {}]   ;;  %s2501_s2 = inlined_call_operand.vmem [shape: f32[1,128], index: 2, kind: input, shape index: {}]   ;;  %s2502_s3 = inlined_call_operand.hbm [shape: bf16[128,128], index: 3, kind: input, shape index: {}]   ;;  %s2503_s4 = inlined_call_operand.vmem [shape: f32[1,128], index: 4, kind: input, shape index: {}]   ;;  %s2504_s5 = inlined_call_operand.hbm [shape: f32[2,256,128], index: 5, kind: output, shape index: {}]  }
   0x1   :  { %2515 = sst [smem:[#allocation19_spill]] %s2500_s1 }
   0x2   :  { %2516 = sst [smem:[#allocation20_spill]] %s2502_s3 }
   0x3   :  { %2517 = sst [smem:[#allocation21_spill]] %s2504_s5 }
   0x4   :  { %10 = vsyncpa [#allocation3], 0 }
   0x5   :  { %12 = vsyncpa [#allocation3 + $0x1], 0 }
   0x6   :  { %13 = vsyncpa [#allocation6], 0 }
   0x7   :  { %14 = vsyncpa [#allocation4], 0 }
   0x8   :  { %16 = vsyncpa [#allocation4 + $0x1], 0  ;;  %s2117_s18 = smov 0   ;;  %s2119_s19 = smov 0  }
   0x9   :  { %s2121_s20 = smov 0   ;;  %s2123_s21 = smov 0  }
   0xa   :  { %s2125_s22 = smov 0   ;;  %s2127_s23 = smov 0  }
   0xb   :  { %s2129_s24 = smov 0   ;;  %s2131_s25 = smov 0  }
   0xc LB: > { %2518 = sst [smem:[#allocation12_spill]] %s2049_s18  ;;  %s1411_s26 = sadd.s32 4294967295, %s2077_s25   ;;  %s2077_s25 = sphi %s2131_s25, %s22_s25   ;;  %s2073_s24 = sphi %s2129_s24, %s2548_s24   ;;  %s2069_s23 = sphi %s2127_s23, %s2542_s23   ;;  %s2065_s22 = sphi %s2125_s22, %s2547_s22   ;;  %s2061_s21 = sphi %s2123_s21, %s2541_s21   ;;  %s2057_s20 = sphi %s2121_s20, %s2546_s20   ;;  %s2053_s19 = sphi %s2119_s19, %s2545_s19   ;;  %s2049_s18 = sphi %s2117_s18, %s2544_s18  }
   0xd   : > { %2519 = sst [smem:[#allocation13_spill]] %s2069_s23  ;;  %s1412_s27 = sadd.s32 4294967294, %s2077_s25  }
   0xe   : > { %2520 = sst [smem:[#allocation14_spill]] %s2077_s25  ;;  %p56_p0 = scmp.ne.s32.totalorder %s2053_s19, %s2049_s18 }
   0xf   : > { %p2161_p1 = scmp.eq.s32.totalorder %s1411_s26, 0  ;;  %p2165_p2 = scmp.eq.s32.totalorder %s1411_s26, 3 }
  0x10   : > { %p172_p3 = scmp.eq.s32.totalorder %s1412_s27, 3  ;;  %p1413_p5 = scmp.ge.s32.totalorder %s2077_s25, 1 }
  0x11   : > { %p2171_p4 = por %p2161_p1, %p56_p0  ;;  %p179_p7 = scmp.lt.s32.totalorder %s2077_s25, 5 }
  0x12   : > { %p2176_p6 = por %p172_p3, %p56_p0  ;;  %s2526_s1 = sld [smem:[#allocation19_spill]] }
  0x13   : > { %p2184_p8 = pnand %p1413_p5, %p179_p7  ;;  %s2079_s11 = smov [#allocation5]  }
  0x14   : > { %s2524_s6 = scalar_select %p2176_p6, 1, 0 }
  0x15   : > { %p1726_p9 = pneg %p2184_p8  ;;  %s192_s12 = sshll.u32 %s2079_s11, 4  ;;  %s193_s12 = int_to_ptr.vmem [resolvable:$true] %s192_s12 }
  0x16   : > { %2525 = sst [smem:[#allocation15_spill]] %s2524_s6  ;;  %s2080_s16 = smov 64  }
  0x17   : > { %p1727_p10 = pnand %p1726_p9, %p2161_p1  ;;  %s2528_s3 = sld [smem:[#allocation20_spill]] }
  0x18   : > { %s190_s9 = sshll.u32 %s2526_s1, 4  ;;  %s2081_s17 = smov 4   ;;  %s191_s9 = int_to_ptr.hbm [resolvable:$true] %s190_s9 }
  0x19   : > { %1729 = dma.hbm_to_vmem [thread:$0]  (!%p1727_p10), %s191_s9, 3072, %s193_s12, [#allocation6], %s2080_s16, %s2080_s16, %s2081_s17  }
  0x1a   : > { %s2082_s26 = smov [#allocation7]   ;;  %s31_s7 = sadd.s32 1, %s2069_s23 }
  0x1b   : > { %s209_s27 = sshll.u32 %s2082_s26, 4  ;;  %s34_s8 = sadd.s32 1, %s2073_s24  ;;  %s210_s27 = int_to_ptr.vmem [resolvable:$true] %s209_s27 }
  0x1c   : > { %p32_p11 = scmp.ge.s32.totalorder %s31_s7, 2  ;;  %s43_s11 = sadd.s32 1, %s2057_s20 }
  0x1d   : > { %s207_s15 = sshll.u32 %s2528_s3, 4  ;;  %p50_p12 = scmp.ne.s32.totalorder %s2057_s20, %s2053_s19  ;;  %s208_s15 = int_to_ptr.hbm [resolvable:$true] %s207_s15 }
  0x1e   : > { %1732 = dma.hbm_to_vmem [thread:$0]  (!%p1727_p10), %s208_s15, 1024, %s210_s27, [#allocation6], %s2080_s16, %s2080_s16, %s2081_s17  }
  0x1f   : > { %p51_p13 = scmp.eq.s32.totalorder %s2077_s25, 0  ;;  %s2550_s7 = smov (%p32_p11, %s31_s7), 0 }
  0x20   : > { %2529 = sst [smem:[#allocation16_spill]] %s2550_s7  ;;  %s2552_s8 = smov (!%p32_p11, %s34_s8), %s2073_s24 }
  0x21   : > { %s39_s9 = ssub.s32 %s2069_s23, %s2550_s7  ;;  %p2206_p0 = por %p51_p13, %p50_p12 }
  0x22   : > { %p36_p3 = scmp.ge.s32.totalorder %s2552_s8, 2  ;;  %p2212_p5 = por %p2165_p2, %p50_p12 }
  0x23   : > { %p1743_p7 = scmp.lt.s32.totalorder %s2077_s25, 4  ;;  %s226_s14 = sand.u32 1, %s2057_s20  }
  0x24   : > { %s2531_s13 = scalar_select %p2212_p5, 1, 0 }
  0x25   : > { %s2554_s8 = smov (%p36_p3, %s2552_s8), 0  ;;  %s1710_s15 = smul.u32 192, %s226_s14 }
  0x26   : > { %2532 = sst [smem:[#allocation17_spill]] %s2531_s13  ;;  %s38_s16 = ssub.s32 %s2073_s24, %s2554_s8 }
  0x27   : > { %2533 = sst [smem:[#allocation18_spill]] %s2554_s8  ;;  %s1711_s17 = smul.u32 48, %s2069_s23 }
  0x28   : > { %s40_s26 = sor.u32 %s39_s9, %s38_s16  ;;  %s1712_s27 = smul.u32 96, %s2073_s24 }
  0x29   : > { %p41_p9 = scmp.eq.s32.totalorder %s40_s26, 0  ;;  %s230_s1 = scalar_lea.vmem [#allocation2], %s1710_s15 }
  0x2a   : > { %s241_s3 = sshll.u32 %s230_s1, 4  ;;  %p1734_p10 = pnand %p1743_p7, %p2206_p0  ;;  %s242_s3 = int_to_ptr.vmem [resolvable:$true] %s241_s3 }
  0x2b   : > { %s2227_s29 = scalar_select %p41_p9, %s2057_s20, %s43_s11  }
  0x2c   : > { %s236_s7 = sadd.s32 %s1712_s27, %s1711_s17  ;;  %s227_s8 = scalar_lea.sflag [#allocation3], %s226_s14 }
  0x2d   : > { %s1419_s6 = sshll.u32 %s236_s7, 2  ;;  %s2083_s23 = smov 192  }
  0x2e   : > { %s238_s13 = scalar_lea.hbm %s2499_s0, %s1419_s6  ;;  %s2084_s9 = smov 12  }
  0x2f   : > { %s239_s5 = sshll.u32 %s238_s13, 4  ;;  %253 = sbr.rel (%p2184_p8) target bundleno = 525 (0x20d), region = 40  ;;  %s240_s5 = int_to_ptr.hbm [resolvable:$true] %s239_s5 }
  0x30   : > { %1736 = dma.hbm_to_vmem [thread:$0]  (!%p1734_p10), %s240_s5, 3072, %s242_s3, %s227_s8, %s2083_s23, %s2083_s23, %s2084_s9  }
  0x31   : > { %s2235_s1 = sand.u32 (!%p2184_p8), 1, %s2053_s19  }
  0x32   : > { %s1713_s7 = smul.u32 (!%p2184_p8), 192, %s2235_s1  ;;  %s256_s11 = scalar_lea.sflag (!%p2184_p8), [#allocation3], %s2235_s1 }
  0x34   : > { %s2239_s12 = scalar_lea.vmem [#allocation2], %s1713_s7 }
  0x35   : > { %2036 = dma.done.wait (%p2171_p4), %s256_s11, 3072  }
  0x36   : > { %2038 = vsyncadd (%p2171_p4), %s256_s11, 4294964224 }
  0x37   : > { %2040 = dma.done.wait (%p2161_p1), [#allocation6], 4096  }
  0x38   : > { %2042 = vsyncadd (%p2161_p1), [#allocation6], 4294963200  ;;  %v1685_v0 = vld [vmem:[#allocation5 + $0x38] sm:$0xff]  ;;  %v1684_v3 = vld [vmem:[#allocation5 + $0x30] sm:$0xff]  ;;  %s1423_s25 = sshll.u32 %s2235_s1, 7  ;;  %s1649_s30 = sshll.u32 %s2061_s21, 4 }
  0x39   : > { %v1693_v1 = vld [vmem:[#allocation5 + $0x78] sm:$0xff]  ;;  %655 = vmatpush.bf16.msra.mxu0 %v1685_v0  ;;  %v1692_v4 = vld [vmem:[#allocation5 + $0x70] sm:$0xff]  ;;  %v1683_v6 = vld [vmem:[#allocation5 + $0x28] sm:$0xff]  ;;  %s2346_s28 = scalar_lea.vmem [#allocation8], %s1423_s25  ;;  %s1650_s6 = sshll.u32 %s2065_s22, 5 }
  0x3a   : > { %v1701_v2 = vld [vmem:[#allocation5 + $0xb8] sm:$0xff]  ;;  %704 = vmatpush.bf16.msra.mxu1 %v1693_v1  ;;  %v1700_v5 = vld [vmem:[#allocation5 + $0xb0] sm:$0xff]  ;;  %v1691_v7 = vld [vmem:[#allocation5 + $0x68] sm:$0xff]  ;;  %s1296_s10 = sadd.s32 %s1650_s6, %s1649_s30  ;;  %s2536_s13 = sld [smem:[#allocation21_spill]] }
  0x3b   : > { %753 = vmatpush.bf16.msra.mxu2 %v1701_v2  ;;  %v1699_v8 = vld [vmem:[#allocation5 + $0xa8] sm:$0xff]  ;;  %v1682_v9 = vld [vmem:[#allocation5 + $0x20] sm:$0xff]  ;;  %v1681_v12 = vld [vmem:[#allocation5 + $0x18] sm:$0xff]  ;;  %s1651_s21 = sshll.u32 %s1296_s10, 3  ;;  %s1299_s15 = sshll.u32 %s2346_s28, 4  ;;  %s1300_s15 = int_to_ptr.vmem [resolvable:$true] %s1299_s15 }
  0x3c   : > { %v1690_v10 = vld [vmem:[#allocation5 + $0x60] sm:$0xff]  ;;  %v1689_v13 = vld [vmem:[#allocation5 + $0x58] sm:$0xff]  ;;  %v1680_v15 = vld [vmem:[#allocation5 + $0x10] sm:$0xff]  ;;  %s1285_s26 = scalar_lea.sflag [#allocation4], %s2235_s1 }
  0x3d   : > { %656 = vmatpush.bf16.msra.mxu0 %v1684_v3  ;;  %v1698_v11 = vld [vmem:[#allocation5 + $0xa0] sm:$0xff]  ;;  %v1697_v14 = vld [vmem:[#allocation5 + $0x98] sm:$0xff]  ;;  %v1688_v16 = vld [vmem:[#allocation5 + $0x50] sm:$0xff] }
  0x3e   : > { %705 = vmatpush.bf16.msra.mxu1 %v1692_v4  ;;  %v1696_v17 = vld [vmem:[#allocation5 + $0x90] sm:$0xff]  ;;  %v1679_v18 = vld [vmem:[#allocation5 + $0x8] sm:$0xff]  ;;  %v1678_v21 = vld [vmem:[#allocation5] sm:$0xff] }
  0x3f   : > { %754 = vmatpush.bf16.msra.mxu2 %v1700_v5  ;;  %v1687_v19 = vld [vmem:[#allocation5 + $0x48] sm:$0xff]  ;;  %v1686_v22 = vld [vmem:[#allocation5 + $0x40] sm:$0xff]  ;;  %v1428_v26 = vld [vmem:[%s2239_s12 + $0xc] sm:$0xf0] }
  0x40   : > { %v1695_v20 = vld [vmem:[#allocation5 + $0x88] sm:$0xff]  ;;  %v1426_v23 = vld [vmem:[%s2239_s12] sm:$0xf]  ;;  %v1654_v25 = vld [vmem:[%s2239_s12 + $0x4] sm:$0xf]  ;;  %s1298_s14 = scalar_lea.hbm %s2536_s13, %s1651_s21 }
  0x41   : > { %657 = vmatpush.bf16.msra.mxu0 %v1683_v6  ;;  %v1655_v24 = vld [vmem:[%s2239_s12 + $0x8] sm:$0xf0]  ;;  %v1694_v27 = vld [vmem:[#allocation5 + $0x80] sm:$0xff]  ;;  %v1434_v28 = vld [vmem:[%s2239_s12 + $0x8] sm:$0xf]  ;;  %v1431_v31 = vor.u32 %v1654_v25, %v1428_v26  ;;  %s1301_s16 = sshll.u32 %s1298_s14, 4  ;;  %s1302_s16 = int_to_ptr.hbm [resolvable:$true] %s1301_s16 }
  0x42   : > { %706 = vmatpush.bf16.msra.mxu1 %v1691_v7  ;;  %v1656_v29 = vld [vmem:[%s2239_s12 + $0x10] sm:$0xf0]  ;;  %v1427_v30 = vor.u32 %v1655_v24, %v1426_v23  ;;  %v1438_v33 = vld [vmem:[%s2239_s12 + $0x18] sm:$0xf]  ;;  %v1658_v34 = vld [vmem:[%s2239_s12 + $0x20] sm:$0xf0] }
  0x43   : > { %755 = vmatpush.bf16.msra.mxu2 %v1699_v8  ;;  %v1435_v32 = vor.u32 %v1656_v29, %v1434_v28  ;;  %v1657_v35 = vld [vmem:[%s2239_s12 + $0x1c] sm:$0xf]  ;;  %v1440_v36 = vld [vmem:[%s2239_s12 + $0x24] sm:$0xf0]  ;;  %v1446_v37 = vld [vmem:[%s2239_s12 + $0x20] sm:$0xf]  ;;  %v1439_v39 = vor.u32 %v1658_v34, %v1438_v33 }
  0x44   : > { %v1659_v38 = vld [vmem:[%s2239_s12 + $0x28] sm:$0xf0]  ;;  %v1443_v40 = vor.u32 %v1657_v35, %v1440_v36  ;;  %v1450_v42 = vld [vmem:[%s2239_s12 + $0x30] sm:$0xf]  ;;  %v1661_v43 = vld [vmem:[%s2239_s12 + $0x38] sm:$0xf0] }
  0x45   : > { %658 = vmatpush.bf16.msra.mxu0 %v1682_v9  ;;  %v1447_v41 = vor.u32 %v1659_v38, %v1446_v37  ;;  %v1660_v44 = vld [vmem:[%s2239_s12 + $0x34] sm:$0xf]  ;;  %v1452_v45 = vld [vmem:[%s2239_s12 + $0x3c] sm:$0xf0]  ;;  %v1458_v46 = vld [vmem:[%s2239_s12 + $0x38] sm:$0xf]  ;;  %v1451_v48 = vor.u32 %v1661_v43, %v1450_v42 }
  0x46   : > { %707 = vmatpush.bf16.msra.mxu1 %v1690_v10  ;;  %v1662_v47 = vld [vmem:[%s2239_s12 + $0x40] sm:$0xf0]  ;;  %v1455_v49 = vor.u32 %v1660_v44, %v1452_v45  ;;  %v1462_v51 = vld [vmem:[%s2239_s12 + $0x48] sm:$0xf]  ;;  %v1664_v52 = vld [vmem:[%s2239_s12 + $0x50] sm:$0xf0] }
  0x47   : > { %756 = vmatpush.bf16.msra.mxu2 %v1698_v11  ;;  %v1459_v50 = vor.u32 %v1662_v47, %v1458_v46  ;;  %v1663_v53 = vld [vmem:[%s2239_s12 + $0x4c] sm:$0xf]  ;;  %v1464_v54 = vld [vmem:[%s2239_s12 + $0x54] sm:$0xf0]  ;;  %v1470_v55 = vld [vmem:[%s2239_s12 + $0x50] sm:$0xf]  ;;  %v1463_v57 = vor.u32 %v1664_v52, %v1462_v51 }
  0x48   : > { %v1665_v56 = vld [vmem:[%s2239_s12 + $0x58] sm:$0xf0]  ;;  %v1467_v58 = vor.u32 %v1663_v53, %v1464_v54  ;;  %v1474_v60 = vld [vmem:[%s2239_s12 + $0x60] sm:$0xf]  ;;  %v1667_v61 = vld [vmem:[%s2239_s12 + $0x68] sm:$0xf0] }
  0x49   : > { %659 = vmatpush.bf16.msra.mxu0 %v1681_v12  ;;  %v1471_v59 = vor.u32 %v1665_v56, %v1470_v55  ;;  %v1666_v62 = vld [vmem:[%s2239_s12 + $0x64] sm:$0xf]  ;;  %v1476_v63 = vld [vmem:[%s2239_s12 + $0x6c] sm:$0xf0]  ;;  %v1482_v0 = vld [vmem:[%s2239_s12 + $0x68] sm:$0xf]  ;;  %v1475_v2 = vor.u32 %v1667_v61, %v1474_v60 }
  0x4a   : > { %708 = vmatpush.bf16.msra.mxu1 %v1689_v13  ;;  %v1668_v1 = vld [vmem:[%s2239_s12 + $0x70] sm:$0xf0]  ;;  %v1479_v3 = vor.u32 %v1666_v62, %v1476_v63  ;;  %v1486_v5 = vld [vmem:[%s2239_s12 + $0x78] sm:$0xf]  ;;  %v1670_v6 = vld [vmem:[%s2239_s12 + $0x80] sm:$0xf0] }
  0x4b   : > { %757 = vmatpush.bf16.msra.mxu2 %v1697_v14  ;;  %v1483_v4 = vor.u32 %v1668_v1, %v1482_v0  ;;  %v1669_v7 = vld [vmem:[%s2239_s12 + $0x7c] sm:$0xf]  ;;  %v1488_v8 = vld [vmem:[%s2239_s12 + $0x84] sm:$0xf0]  ;;  %v1494_v9 = vld [vmem:[%s2239_s12 + $0x80] sm:$0xf]  ;;  %v1487_v11 = vor.u32 %v1670_v6, %v1486_v5 }
  0x4c   : > { %v1671_v10 = vld [vmem:[%s2239_s12 + $0x88] sm:$0xf0]  ;;  %v1491_v12 = vor.u32 %v1669_v7, %v1488_v8  ;;  %v1709_v14 = vld [vmem:[#allocation7 + $0x38] sm:$0xff]  ;;  %v1706_v26 = vld [vmem:[#allocation7 + $0x20] sm:$0xff]  ;;  %s1989_s27 = sshra.s32 %s1302_s16, 4  ;;  %s1990_s27 = int_to_ptr.hbm [resolvable:$true] %s1989_s27 }
  0x4d   : > { %660 = vmatpush.bf16.msra.mxu0 %v1680_v15  ;;  %v1495_v13 = vor.u32 %v1671_v10, %v1494_v9  ;;  %894 = vmatpush.bf16.msra.mxu3 %v1709_v14  ;;  %v1708_v15 = vld [vmem:[#allocation7 + $0x30] sm:$0xff]  ;;  %v1510_v29 = vld [vmem:[%s2239_s12 + $0xa8] sm:$0xf]  ;;  %v1677_v34 = vld [vmem:[%s2239_s12 + $0xb8] sm:$0xf0]  ;;  %s1991_s9 = scalar_lea.hbm %s1990_s27, 128  ;;  %p1996_p8 = scmp.lt.s32.totalorder %s1990_s27, %s2536_s13 }
  0x4e   : > { %709 = vmatpush.bf16.msra.mxu1 %v1688_v16  ;;  %v1707_v16 = vld [vmem:[#allocation7 + $0x28] sm:$0xff]  ;;  %v1704_v28 = vld [vmem:[#allocation7 + $0x10] sm:$0xff]  ;;  %v2300_v42 = vld [vmem:[%s2501_s2] ss:$0 sm:$0xff]  ;;  %p1992_p1 = scmp.ne.s32.totalorder %s1990_s27, %s1991_s9 }
  0x4f   : > { %758 = vmatpush.bf16.msra.mxu2 %v1696_v17  ;;  %v1498_v17 = vld [vmem:[%s2239_s12 + $0x90] sm:$0xf]  ;;  %v1703_v35 = vld [vmem:[#allocation7 + $0x8] sm:$0xff] }
  0x50   : > { %v1518_v33 = vld [vmem:[%s2239_s12 + $0xb0] sm:$0xf]  ;;  %p1993_p2 = pnand %p1992_p1, %p2212_p5 }
  0x51   : > { %661 = vmatpush.bf16.msra.mxu0 %v1679_v18  ;;  %895 = vmatpush.bf16.msra.mxu3 %v1708_v15  ;;  %v1673_v18 = vld [vmem:[%s2239_s12 + $0x98] sm:$0xf0]  ;;  %v1519_v38 = vor.u32 %v1677_v34, %v1518_v33 }
  0x52   : > { %710 = vmatpush.bf16.msra.mxu1 %v1687_v19  ;;  %v1672_v19 = vld [vmem:[%s2239_s12 + $0x94] sm:$0xf]  ;;  %v1499_v23 = vor.u32 %v1673_v18, %v1498_v17  ;;  %p1994_p4 = pneg %p1993_p2 }
  0x53   : > { %759 = vmatpush.bf16.msra.mxu2 %v1695_v20  ;;  %v1500_v20 = vld [vmem:[%s2239_s12 + $0x9c] sm:$0xf0] }
  0x54   : > { %v1503_v24 = vor.u32 %v1672_v19, %v1500_v20 }
  0x55   : > { %662 = vmatpush.bf16.msra.mxu0 %v1678_v21  ;;  %v1506_v21 = vld [vmem:[%s2239_s12 + $0x98] sm:$0xf]  ;;  %896 = vmatpush.bf16.msra.mxu3 %v1707_v16 }
  0x56   : > { %711 = vmatpush.bf16.msra.mxu1 %v1686_v22  ;;  %v1674_v22 = vld [vmem:[%s2239_s12 + $0xa0] sm:$0xf0] }
  0x57   : > { %760 = vmatpush.bf16.msra.mxu2 %v1694_v27  ;;  %v1507_v25 = vor.u32 %v1674_v22, %v1506_v21  ;;  %v1705_v27 = vld [vmem:[#allocation7 + $0x18] sm:$0xff] }
  0x58   : > { %663 = vmatmul.bf16.vlgmr.msra.gmra.mxu0 %v1427_v30  ;;  %v1676_v30 = vld [vmem:[%s2239_s12 + $0xb0] sm:$0xf0] }
  0x59   : > { %712 = vmatmul.bf16.vlgmr.msra.gmra.mxu1 %v1431_v31  ;;  %897 = vmatpush.bf16.msra.mxu3 %v1706_v26  ;;  %v1675_v31 = vld [vmem:[%s2239_s12 + $0xac] sm:$0xf]  ;;  %v1511_v36 = vor.u32 %v1676_v30, %v1510_v29 }
  0x5a   : > { %761 = vmatmul.bf16.vlgmr.msra.gmra.mxu2 %v1435_v32  ;;  %v1512_v32 = vld [vmem:[%s2239_s12 + $0xb4] sm:$0xf0]  ;;  %s1995_s12 = scalar_lea.hbm %s2536_s13, 512 }
  0x5b   : > { %v1515_v37 = vor.u32 %v1675_v31, %v1512_v32  ;;  %p1997_p11 = scmp.lt.s32.totalorder %s1995_s12, %s1991_s9 }
  0x5d   : > { %898 = vmatpush.bf16.msra.mxu3 %v1705_v27  ;;  %p1998_p12 = por %p1997_p11, %p1996_p8 }
  0x5f   : > { %p1999_p13 = pnand %p1998_p12, %p1994_p4 }
  0x61   : > { %899 = vmatpush.bf16.msra.mxu3 %v1704_v28 }
  0x65   : > { %900 = vmatpush.bf16.msra.mxu3 %v1703_v35 }
  0x68   : > { %668 = vmatmul.bf16.gmra.mxu0 %v1439_v39  ;;  %v1702_v39 = vld [vmem:[#allocation7] sm:$0xff] }
  0x69   : > { %717 = vmatmul.bf16.gmra.mxu1 %v1443_v40  ;;  %901 = vmatpush.bf16.msra.mxu3 %v1702_v39 }
  0x6a   : > { %766 = vmatmul.bf16.gmra.mxu2 %v1447_v41 }
  0x78   : > { %673 = vmatmul.bf16.gmra.mxu0 %v1451_v48 }
  0x79   : > { %722 = vmatmul.bf16.gmra.mxu1 %v1455_v49 }
  0x7a   : > { %771 = vmatmul.bf16.gmra.mxu2 %v1459_v50 }
  0x88   : > { %678 = vmatmul.bf16.gmra.mxu0 %v1463_v57 }
  0x89   : > { %727 = vmatmul.bf16.gmra.mxu1 %v1467_v58 }
  0x8a   : > { %776 = vmatmul.bf16.gmra.mxu2 %v1471_v59 }
  0x98   : > { %683 = vmatmul.bf16.gmra.mxu0 %v1475_v2 }
  0x99   : > { %732 = vmatmul.bf16.gmra.mxu1 %v1479_v3 }
  0x9a   : > { %781 = vmatmul.bf16.gmra.mxu2 %v1483_v4 }
  0xa8   : > { %688 = vmatmul.bf16.gmra.mxu0 %v1487_v11 }
  0xa9   : > { %737 = vmatmul.bf16.gmra.mxu1 %v1491_v12 }
  0xaa   : > { %786 = vmatmul.bf16.gmra.mxu2 %v1495_v13 }
  0xb8   : > { %693 = vmatmul.bf16.gmra.mxu0 %v1499_v23 }
  0xb9   : > { %742 = vmatmul.bf16.gmra.mxu1 %v1503_v24 }
  0xba   : > { %791 = vmatmul.bf16.gmra.mxu2 %v1507_v25 }
  0xc8   : > { %698 = vmatmul.bf16.gmra.mxu0 %v1511_v36 }
  0xc9   : > { %747 = vmatmul.bf16.gmra.mxu1 %v1515_v37 }
  0xca   : > { %796 = vmatmul.bf16.gmra.mxu2 %v1519_v38 }
  0xd5   : > { %v664_v40 = vpop.f32.mrf.mxu0 }
  0xd6   : > { %v713_v41 = vpop.f32.mrf.mxu1  ;;  %v665_v43 = vadd.f32 %v2300_v42, %v664_v40 }
  0xd8   : > { %v714_v47 = vadd.f32 %v713_v41, %v665_v43 }
  0xdd   : > { %v762_v44 = vpop.f32.mrf.mxu2  ;;  %v666_v45 = vpop.f32.mrf.mxu0 }
  0xde   : > { %v715_v46 = vpop.f32.mrf.mxu1  ;;  %v667_v48 = vadd.f32 %v2300_v42, %v666_v45  ;;  %v763_v49 = vadd.f32 %v762_v44, %v714_v47 }
  0xe0   : > { %v716_v50 = vadd.f32 %v715_v46, %v667_v48  ;;  %v802_v55 = vmax.f32 %v763_v49, 0.0 }
  0xe5   : > { %v764_v51 = vpop.f32.mrf.mxu2  ;;  %v669_v53 = vpop.f32.mrf.mxu0 }
  0xe6   : > { %v765_v52 = vadd.f32 %v764_v51, %v716_v50  ;;  %v718_v54 = vpop.f32.mrf.mxu1  ;;  %v670_v58 = vadd.f32 %v2300_v42, %v669_v53 }
  0xe8   : > { %v803_v56 = vmax.f32 %v765_v52, 0.0  ;;  %v719_v62 = vadd.f32 %v718_v54, %v670_v58 }
  0xea   : > { %v818_v57 = vpack.c.bf16 %v803_v56, %v802_v55 }
  0xec   : > { %902 = vmatmul.bf16.vlgmr.msra.gmra.mxu3 %v818_v57 }
  0xed   : > { %v767_v59 = vpop.f32.mrf.mxu2  ;;  %v671_v60 = vpop.f32.mrf.mxu0 }
  0xee   : > { %v720_v61 = vpop.f32.mrf.mxu1  ;;  %v672_v63 = vadd.f32 %v2300_v42, %v671_v60  ;;  %v768_v0 = vadd.f32 %v767_v59, %v719_v62 }
  0xf0   : > { %v721_v1 = vadd.f32 %v720_v61, %v672_v63  ;;  %v804_v6 = vmax.f32 %v768_v0, 0.0 }
  0xf5   : > { %v769_v2 = vpop.f32.mrf.mxu2  ;;  %v674_v4 = vpop.f32.mrf.mxu0 }
  0xf6   : > { %v770_v3 = vadd.f32 %v769_v2, %v721_v1  ;;  %v723_v5 = vpop.f32.mrf.mxu1  ;;  %v675_v9 = vadd.f32 %v2300_v42, %v674_v4 }
  0xf8   : > { %v805_v7 = vmax.f32 %v770_v3, 0.0  ;;  %v724_v13 = vadd.f32 %v723_v5, %v675_v9 }
  0xfa   : > { %v819_v8 = vpack.c.bf16 %v805_v7, %v804_v6 }
  0xfc   : > { %907 = vmatmul.bf16.gmra.mxu3 %v819_v8 }
  0xfd   : > { %v772_v10 = vpop.f32.mrf.mxu2  ;;  %v676_v11 = vpop.f32.mrf.mxu0 }
  0xfe   : > { %v725_v12 = vpop.f32.mrf.mxu1  ;;  %v677_v14 = vadd.f32 %v2300_v42, %v676_v11  ;;  %v773_v15 = vadd.f32 %v772_v10, %v724_v13 }
 0x100   : > { %v726_v16 = vadd.f32 %v725_v12, %v677_v14  ;;  %v806_v21 = vmax.f32 %v773_v15, 0.0 }
 0x105   : > { %v774_v17 = vpop.f32.mrf.mxu2  ;;  %v679_v19 = vpop.f32.mrf.mxu0 }
 0x106   : > { %v775_v18 = vadd.f32 %v774_v17, %v726_v16  ;;  %v728_v20 = vpop.f32.mrf.mxu1  ;;  %v680_v24 = vadd.f32 %v2300_v42, %v679_v19 }
 0x108   : > { %v807_v22 = vmax.f32 %v775_v18, 0.0  ;;  %v729_v28 = vadd.f32 %v728_v20, %v680_v24 }
 0x10a   : > { %v820_v23 = vpack.c.bf16 %v807_v22, %v806_v21 }
 0x10c   : > { %912 = vmatmul.bf16.gmra.mxu3 %v820_v23 }
 0x10d   : > { %v777_v25 = vpop.f32.mrf.mxu2  ;;  %v681_v26 = vpop.f32.mrf.mxu0 }
 0x10e   : > { %v730_v27 = vpop.f32.mrf.mxu1  ;;  %v682_v29 = vadd.f32 %v2300_v42, %v681_v26  ;;  %v778_v30 = vadd.f32 %v777_v25, %v729_v28 }
 0x110   : > { %v731_v31 = vadd.f32 %v730_v27, %v682_v29  ;;  %v808_v36 = vmax.f32 %v778_v30, 0.0 }
 0x115   : > { %v779_v32 = vpop.f32.mrf.mxu2  ;;  %v684_v34 = vpop.f32.mrf.mxu0 }
 0x116   : > { %v780_v33 = vadd.f32 %v779_v32, %v731_v31  ;;  %v733_v35 = vpop.f32.mrf.mxu1  ;;  %v685_v39 = vadd.f32 %v2300_v42, %v684_v34  ;;  %v2321_v34 = vld [vmem:[%s2503_s4] ss:$0 sm:$0xff] }
 0x118   : > { %v809_v37 = vmax.f32 %v780_v33, 0.0  ;;  %v734_v44 = vadd.f32 %v733_v35, %v685_v39 }
 0x11a   : > { %v821_v38 = vpack.c.bf16 %v809_v37, %v808_v36 }
 0x11c   : > { %917 = vmatmul.bf16.gmra.mxu3 %v821_v38 }
 0x11d   : > { %v782_v40 = vpop.f32.mrf.mxu2  ;;  %v686_v41 = vpop.f32.mrf.mxu0 }
 0x11e   : > { %v735_v43 = vpop.f32.mrf.mxu1  ;;  %v687_v45 = vadd.f32 %v2300_v42, %v686_v41  ;;  %v783_v46 = vadd.f32 %v782_v40, %v734_v44 }
 0x120   : > { %v736_v47 = vadd.f32 %v735_v43, %v687_v45  ;;  %v810_v52 = vmax.f32 %v783_v46, 0.0 }
 0x125   : > { %v784_v48 = vpop.f32.mrf.mxu2  ;;  %v689_v50 = vpop.f32.mrf.mxu0 }
 0x126   : > { %v785_v49 = vadd.f32 %v784_v48, %v736_v47  ;;  %v738_v51 = vpop.f32.mrf.mxu1  ;;  %v690_v55 = vadd.f32 %v2300_v42, %v689_v50  ;;  %v943_v47 = vlaneseq }
 0x128   : > { %v811_v53 = vmax.f32 %v785_v49, 0.0  ;;  %v739_v59 = vadd.f32 %v738_v51, %v690_v55 }
 0x12a   : > { %v822_v54 = vpack.c.bf16 %v811_v53, %v810_v52  ;;  %v944_v52 = vand.u32 127, %v943_v47 }
 0x12c   : > { %922 = vmatmul.bf16.gmra.mxu3 %v822_v54  ;;  %vm1249_vm0 = vcmp.ge.s32.totalorder %v944_v52, 18  ;;  %vm1250_vm1 = vcmp.lt.s32.totalorder %v944_v52, 21 }
 0x12d   : > { %v787_v56 = vpop.f32.mrf.mxu2  ;;  %v691_v57 = vpop.f32.mrf.mxu0  ;;  %vm2337_vm4 = vmand %vm1249_vm0, %vm1250_vm1 }
 0x12e   : > { %v740_v58 = vpop.f32.mrf.mxu1  ;;  %v692_v60 = vadd.f32 %v2300_v42, %v691_v57  ;;  %v788_v61 = vadd.f32 %v787_v56, %v739_v59 }
 0x130   : > { %v741_v62 = vadd.f32 %v740_v58, %v692_v60  ;;  %v812_v3 = vmax.f32 %v788_v61, 0.0 }
 0x135   : > { %v789_v63 = vpop.f32.mrf.mxu2  ;;  %v694_v1 = vpop.f32.mrf.mxu0 }
 0x136   : > { %v790_v0 = vadd.f32 %v789_v63, %v741_v62  ;;  %v743_v2 = vpop.f32.mrf.mxu1  ;;  %v695_v6 = vadd.f32 %v2300_v42, %v694_v1 }
 0x138   : > { %v813_v4 = vmax.f32 %v790_v0, 0.0  ;;  %v744_v10 = vadd.f32 %v743_v2, %v695_v6 }
 0x13a   : > { %v823_v5 = vpack.c.bf16 %v813_v4, %v812_v3 }
 0x13c   : > { %927 = vmatmul.bf16.gmra.mxu3 %v823_v5 }
 0x13d   : > { %v792_v7 = vpop.f32.mrf.mxu2  ;;  %v696_v8 = vpop.f32.mrf.mxu0 }
 0x13e   : > { %v745_v9 = vpop.f32.mrf.mxu1  ;;  %v697_v11 = vadd.f32 %v2300_v42, %v696_v8  ;;  %v793_v12 = vadd.f32 %v792_v7, %v744_v10 }
 0x140   : > { %v746_v13 = vadd.f32 %v745_v9, %v697_v11  ;;  %v814_v17 = vmax.f32 %v793_v12, 0.0 }
 0x145   : > { %v794_v14 = vpop.f32.mrf.mxu2  ;;  %v699_v16 = vpop.f32.mrf.mxu0 }
 0x146   : > { %v795_v15 = vadd.f32 %v794_v14, %v746_v13  ;;  %v748_v19 = vpop.f32.mrf.mxu1  ;;  %v700_v21 = vadd.f32 %v2300_v42, %v699_v16 }
 0x148   : > { %v815_v18 = vmax.f32 %v795_v15, 0.0  ;;  %v749_v24 = vadd.f32 %v748_v19, %v700_v21 }
 0x14a   : > { %v824_v20 = vpack.c.bf16 %v815_v18, %v814_v17 }
 0x14c   : > { %932 = vmatmul.bf16.gmra.mxu3 %v824_v20 }
 0x14d   : > { %v797_v22 = vpop.f32.mrf.mxu2  ;;  %v701_v23 = vpop.f32.mrf.mxu0 }
 0x14e   : > { %v702_v25 = vadd.f32 %v2300_v42, %v701_v23  ;;  %v750_v26 = vpop.f32.mrf.mxu1  ;;  %v798_v27 = vadd.f32 %v797_v22, %v749_v24 }
 0x150   : > { %v751_v28 = vadd.f32 %v750_v26, %v702_v25  ;;  %v816_v31 = vmax.f32 %v798_v27, 0.0 }
 0x155   : > { %v799_v29 = vpop.f32.mrf.mxu2 }
 0x156   : > { %v800_v30 = vadd.f32 %v799_v29, %v751_v28 }
 0x158   : > { %v817_v32 = vmax.f32 %v800_v30, 0.0 }
 0x15a   : > { %v825_v33 = vpack.c.bf16 %v817_v32, %v816_v31 }
 0x15c   : > { %937 = vmatmul.bf16.gmra.mxu3 %v825_v33 }
 0x16f   : > { %v903_v35 = vpop.f32.mrf.mxu3 }
 0x170   : > { %v904_v36 = vadd.f32 %v2321_v34, %v903_v35 }
 0x172   : > { %v945_v37 = vsub.f32 0.0, %v904_v36 }
 0x174   : > { %v961_v38 = vmul.f32 1.442695, %v945_v37 }
 0x176   : > { %1821 = vpow2.f32 %v961_v38 }
 0x177   : > { %v905_v42 = vpop.f32.mrf.mxu3 }
 0x178   : > { %v2325_v39 = vadd.f32 %v2321_v34, %v905_v42 }
 0x17a   : > { %v946_v40 = vsub.f32 0.0, %v2325_v39 }
 0x17c   : > { %v1822_v41 = vpop.eup %1821  ;;  %v963_v43 = vmul.f32 1.442695, %v946_v40 }
 0x17d   : > { %v993_v44 = vadd.f32 1.0, %v1822_v41 }
 0x17e   : > { %1823 = vpow2.f32 %v963_v43 }
 0x17f   : > { %1825 = vrcp.f32 %v993_v44  ;;  %v908_v45 = vpop.f32.mrf.mxu3  ;;  %v1020_v58 = vand.u32 2147483648, %v993_v44  ;;  %v1018_v60 = vand.u32 2147483647, %v993_v44  ;;  %vm1014_vm3 = vweird.f32 %v993_v44 }
 0x180   : > { %v2329_v46 = vadd.f32 %v2321_v34, %v908_v45 }
 0x181   : > { %v1021_v3 = vor.u32 1.1754944e-38, %v1020_v58  ;;  %vm1019_vm6 = vcmp.eq.f32.partialorder %v1018_v60, 8.507059e+37 }
 0x182   : > { %v947_v48 = vsub.f32 0.0, %v2329_v46 }
 0x184   : > { %v1824_v49 = vpop.eup %1823  ;;  %v965_v50 = vmul.f32 1.442695, %v947_v48 }
 0x185   : > { %v1826_v51 = vpop.eup %1825  ;;  %v994_v53 = vadd.f32 1.0, %v1824_v49 }
 0x186   : > { %v1010_v54 = vmul.f32 %v1826_v51, %v993_v44  ;;  %1827 = vpow2.f32 %v965_v50  ;;  %vm1015_vm2 = vweird.f32 %v1826_v51 }
 0x187   : > { %1829 = vrcp.f32 %v994_v53  ;;  %v910_v55 = vpop.f32.mrf.mxu3  ;;  %vm1016_vm5 = vmor %vm1014_vm3, %vm1015_vm2  ;;  %v1035_v12 = vand.u32 2147483648, %v994_v53  ;;  %v1033_v14 = vand.u32 2147483647, %v994_v53  ;;  %vm1029_vm8 = vweird.f32 %v994_v53 }
 0x188   : > { %v1011_v56 = vsub.f32 1.0, %v1010_v54  ;;  %v2333_v57 = vadd.f32 %v2321_v34, %v910_v55 }
 0x189   : > { %v1036_v20 = vor.u32 1.1754944e-38, %v1035_v12  ;;  %vm1034_vm10 = vcmp.eq.f32.partialorder %v1033_v14, 8.507059e+37 }
 0x18a   : > { %v1012_v59 = vmul.f32 %v1826_v51, %v1011_v56  ;;  %v948_v61 = vsub.f32 0.0, %v2333_v57 }
 0x18c   : > { %v1828_v62 = vpop.eup %1827  ;;  %v1013_v63 = vadd.f32 %v1826_v51, %v1012_v59  ;;  %v967_v1 = vmul.f32 1.442695, %v948_v61 }
 0x18d   : > { %v1830_v2 = vpop.eup %1829  ;;  %v995_v4 = vadd.f32 1.0, %v1828_v62 }
 0x18e   : > { %v1017_v5 = vsel %vm1016_vm5, %v1826_v51, %v1013_v63  ;;  %v1025_v6 = vmul.f32 %v1830_v2, %v994_v53  ;;  %1831 = vpow2.f32 %v967_v1  ;;  %vm1030_vm7 = vweird.f32 %v1830_v2 }
 0x18f   : > { %v1022_v7 = vsel %vm1019_vm6, %v1021_v3, %v1017_v5  ;;  %1833 = vrcp.f32 %v995_v4  ;;  %v913_v8 = vpop.f32.mrf.mxu3  ;;  %vm1031_vm9 = vmor %vm1029_vm8, %vm1030_vm7  ;;  %v1050_v29 = vand.u32 2147483648, %v995_v4  ;;  %v1048_v31 = vand.u32 2147483647, %v995_v4 }
 0x190   : > { %v1252_v9 = vsel %vm2337_vm4, %v1022_v7, %v904_v36  ;;  %v1026_v10 = vsub.f32 1.0, %v1025_v6  ;;  %v2344_v11 = vadd.f32 %v2321_v34, %v913_v8  ;;  %vm1044_vm12 = vweird.f32 %v995_v4 }
 0x191   : > { %1268 = vst [vmem:[%s2346_s28] sm:$0xff] %v1252_v9  ;;  %v1051_v38 = vor.u32 1.1754944e-38, %v1050_v29  ;;  %vm1049_vm14 = vcmp.eq.f32.partialorder %v1048_v31, 8.507059e+37 }
 0x192   : > { %v1027_v13 = vmul.f32 %v1830_v2, %v1026_v10  ;;  %v949_v15 = vsub.f32 0.0, %v2344_v11 }
 0x194   : > { %v1832_v16 = vpop.eup %1831  ;;  %v1028_v17 = vadd.f32 %v1830_v2, %v1027_v13  ;;  %v969_v18 = vmul.f32 1.442695, %v949_v15 }
 0x195   : > { %v1834_v19 = vpop.eup %1833  ;;  %v996_v21 = vadd.f32 1.0, %v1832_v16 }
 0x196   : > { %v1032_v22 = vsel %vm1031_vm9, %v1830_v2, %v1028_v17  ;;  %v1040_v23 = vmul.f32 %v1834_v19, %v995_v4  ;;  %1835 = vpow2.f32 %v969_v18  ;;  %vm1045_vm11 = vweird.f32 %v1834_v19 }
 0x197   : > { %v1037_v24 = vsel %vm1034_vm10, %v1036_v20, %v1032_v22  ;;  %1837 = vrcp.f32 %v996_v21  ;;  %v915_v25 = vpop.f32.mrf.mxu3  ;;  %vm1046_vm13 = vmor %vm1044_vm12, %vm1045_vm11  ;;  %v1065_v48 = vand.u32 2147483648, %v996_v21  ;;  %v1063_v50 = vand.u32 2147483647, %v996_v21 }
 0x198   : > { %v1253_v26 = vsel %vm2337_vm4, %v1037_v24, %v2325_v39  ;;  %v1041_v27 = vsub.f32 1.0, %v1040_v23  ;;  %v2354_v28 = vadd.f32 %v2321_v34, %v915_v25  ;;  %vm1059_vm0 = vweird.f32 %v996_v21 }
 0x199   : > { %1269 = vst [vmem:[%s2346_s28 + $0x8] sm:$0xff] %v1253_v26  ;;  %v1066_v56 = vor.u32 1.1754944e-38, %v1065_v48  ;;  %vm1064_vm2 = vcmp.eq.f32.partialorder %v1063_v50, 8.507059e+37 }
 0x19a   : > { %v1042_v30 = vmul.f32 %v1834_v19, %v1041_v27  ;;  %v950_v32 = vsub.f32 0.0, %v2354_v28 }
 0x19c   : > { %v1836_v33 = vpop.eup %1835  ;;  %v1043_v35 = vadd.f32 %v1834_v19, %v1042_v30  ;;  %v971_v36 = vmul.f32 1.442695, %v950_v32 }
 0x19d   : > { %v1838_v37 = vpop.eup %1837  ;;  %v997_v42 = vadd.f32 1.0, %v1836_v33 }
 0x19e   : > { %v1047_v39 = vsel %vm1046_vm13, %v1834_v19, %v1043_v35  ;;  %v1055_v40 = vmul.f32 %v1838_v37, %v996_v21  ;;  %1839 = vpow2.f32 %v971_v36  ;;  %vm1060_vm15 = vweird.f32 %v1838_v37 }
 0x19f   : > { %v1052_v41 = vsel %vm1049_vm14, %v1051_v38, %v1047_v39  ;;  %1841 = vrcp.f32 %v997_v42  ;;  %v918_v43 = vpop.f32.mrf.mxu3  ;;  %vm1061_vm1 = vmor %vm1059_vm0, %vm1060_vm15  ;;  %v1080_v2 = vand.u32 2147483648, %v997_v42  ;;  %v1078_v4 = vand.u32 2147483647, %v997_v42 }
 0x1a0   : > { %v1254_v44 = vsel %vm2337_vm4, %v1052_v41, %v2329_v46  ;;  %v1056_v45 = vsub.f32 1.0, %v1055_v40  ;;  %v2362_v47 = vadd.f32 %v2321_v34, %v918_v43  ;;  %vm1074_vm5 = vweird.f32 %v997_v42 }
 0x1a1   : > { %1270 = vst [vmem:[%s2346_s28 + $0x10] sm:$0xff] %v1254_v44  ;;  %v1081_v10 = vor.u32 1.1754944e-38, %v1080_v2  ;;  %vm1079_vm7 = vcmp.eq.f32.partialorder %v1078_v4, 8.507059e+37 }
 0x1a2   : > { %v1057_v49 = vmul.f32 %v1838_v37, %v1056_v45  ;;  %v951_v51 = vsub.f32 0.0, %v2362_v47 }
 0x1a4   : > { %v1840_v52 = vpop.eup %1839  ;;  %v1058_v53 = vadd.f32 %v1838_v37, %v1057_v49  ;;  %v973_v54 = vmul.f32 1.442695, %v951_v51 }
 0x1a5   : > { %v1842_v55 = vpop.eup %1841  ;;  %v998_v46 = vadd.f32 1.0, %v1840_v52 }
 0x1a6   : > { %v1062_v58 = vsel %vm1061_vm1, %v1838_v37, %v1058_v53  ;;  %v1070_v59 = vmul.f32 %v1842_v55, %v997_v42  ;;  %1843 = vpow2.f32 %v973_v54  ;;  %vm1075_vm3 = vweird.f32 %v1842_v55 }
 0x1a7   : > { %v1067_v60 = vsel %vm1064_vm2, %v1066_v56, %v1062_v58  ;;  %1845 = vrcp.f32 %v998_v46  ;;  %v920_v61 = vpop.f32.mrf.mxu3  ;;  %vm1076_vm6 = vmor %vm1074_vm5, %vm1075_vm3  ;;  %v1095_v19 = vand.u32 2147483648, %v998_v46  ;;  %v1093_v21 = vand.u32 2147483647, %v998_v46 }
 0x1a8   : > { %v1255_v62 = vsel %vm2337_vm4, %v1067_v60, %v2333_v57  ;;  %v1071_v63 = vsub.f32 1.0, %v1070_v59  ;;  %v2370_v1 = vadd.f32 %v2321_v34, %v920_v61  ;;  %vm1089_vm9 = vweird.f32 %v998_v46 }
 0x1a9   : > { %1271 = vst [vmem:[%s2346_s28 + $0x18] sm:$0xff] %v1255_v62  ;;  %v1096_v27 = vor.u32 1.1754944e-38, %v1095_v19  ;;  %vm1094_vm11 = vcmp.eq.f32.partialorder %v1093_v21, 8.507059e+37 }
 0x1aa   : > { %v1072_v3 = vmul.f32 %v1842_v55, %v1071_v63  ;;  %v952_v5 = vsub.f32 0.0, %v2370_v1 }
 0x1ac   : > { %v1844_v6 = vpop.eup %1843  ;;  %v1073_v7 = vadd.f32 %v1842_v55, %v1072_v3  ;;  %v975_v8 = vmul.f32 1.442695, %v952_v5 }
 0x1ad   : > { %v1846_v9 = vpop.eup %1845  ;;  %v999_v57 = vadd.f32 1.0, %v1844_v6 }
 0x1ae   : > { %v1077_v12 = vsel %vm1076_vm6, %v1842_v55, %v1073_v7  ;;  %v1085_v13 = vmul.f32 %v1846_v9, %v998_v46  ;;  %1847 = vpow2.f32 %v975_v8  ;;  %vm1090_vm8 = vweird.f32 %v1846_v9 }
 0x1af   : > { %v1082_v14 = vsel %vm1079_vm7, %v1081_v10, %v1077_v12  ;;  %1849 = vrcp.f32 %v999_v57  ;;  %v923_v15 = vpop.f32.mrf.mxu3  ;;  %vm1091_vm10 = vmor %vm1089_vm9, %vm1090_vm8  ;;  %v1110_v37 = vand.u32 2147483648, %v999_v57  ;;  %v1108_v42 = vand.u32 2147483647, %v999_v57 }
 0x1b0   : > { %v1256_v16 = vsel %vm2337_vm4, %v1082_v14, %v2344_v11  ;;  %v1086_v17 = vsub.f32 1.0, %v1085_v13  ;;  %v2378_v18 = vadd.f32 %v2321_v34, %v923_v15  ;;  %vm1104_vm13 = vweird.f32 %v999_v57 }
 0x1b1   : > { %1272 = vst [vmem:[%s2346_s28 + $0x20] sm:$0xff] %v1256_v16  ;;  %v1111_v45 = vor.u32 1.1754944e-38, %v1110_v37  ;;  %vm1109_vm15 = vcmp.eq.f32.partialorder %v1108_v42, 8.507059e+37 }
 0x1b2   : > { %v1087_v20 = vmul.f32 %v1846_v9, %v1086_v17  ;;  %v953_v22 = vsub.f32 0.0, %v2378_v18 }
 0x1b4   : > { %v1848_v23 = vpop.eup %1847  ;;  %v1088_v24 = vadd.f32 %v1846_v9, %v1087_v20  ;;  %v977_v25 = vmul.f32 1.442695, %v953_v22 }
 0x1b5   : > { %v1850_v26 = vpop.eup %1849  ;;  %v1000_v11 = vadd.f32 1.0, %v1848_v23 }
 0x1b6   : > { %v1092_v29 = vsel %vm1091_vm10, %v1846_v9, %v1088_v24  ;;  %v1100_v30 = vmul.f32 %v1850_v26, %v999_v57  ;;  %1851 = vpow2.f32 %v977_v25  ;;  %vm1105_vm12 = vweird.f32 %v1850_v26 }
 0x1b7   : > { %v1097_v31 = vsel %vm1094_vm11, %v1096_v27, %v1092_v29  ;;  %1853 = vrcp.f32 %v1000_v11  ;;  %v925_v32 = vpop.f32.mrf.mxu3  ;;  %vm1106_vm14 = vmor %vm1104_vm13, %vm1105_vm12  ;;  %v1125_v55 = vand.u32 2147483648, %v1000_v11  ;;  %v1123_v46 = vand.u32 2147483647, %v1000_v11 }
 0x1b8   : > { %v1257_v33 = vsel %vm2337_vm4, %v1097_v31, %v2354_v28  ;;  %v1101_v35 = vsub.f32 1.0, %v1100_v30  ;;  %v2386_v36 = vadd.f32 %v2321_v34, %v925_v32  ;;  %vm1119_vm1 = vweird.f32 %v1000_v11 }
 0x1b9   : > { %1273 = vst [vmem:[%s2346_s28 + $0x28] sm:$0xff] %v1257_v33  ;;  %v1126_v63 = vor.u32 1.1754944e-38, %v1125_v55  ;;  %vm1124_vm3 = vcmp.eq.f32.partialorder %v1123_v46, 8.507059e+37 }
 0x1ba   : > { %v1102_v38 = vmul.f32 %v1850_v26, %v1101_v35  ;;  %v954_v39 = vsub.f32 0.0, %v2386_v36 }
 0x1bc   : > { %v1852_v40 = vpop.eup %1851  ;;  %v1103_v41 = vadd.f32 %v1850_v26, %v1102_v38  ;;  %v979_v43 = vmul.f32 1.442695, %v954_v39 }
 0x1bd   : > { %v1854_v44 = vpop.eup %1853  ;;  %v1001_v28 = vadd.f32 1.0, %v1852_v40 }
 0x1be   : > { %v1107_v48 = vsel %vm1106_vm14, %v1850_v26, %v1103_v41  ;;  %v1115_v49 = vmul.f32 %v1854_v44, %v1000_v11  ;;  %1855 = vpow2.f32 %v979_v43  ;;  %vm1120_vm0 = vweird.f32 %v1854_v44 }
 0x1bf   : > { %v1112_v50 = vsel %vm1109_vm15, %v1111_v45, %v1107_v48  ;;  %1857 = vrcp.f32 %v1001_v28  ;;  %v928_v51 = vpop.f32.mrf.mxu3  ;;  %vm1121_vm2 = vmor %vm1119_vm1, %vm1120_vm0  ;;  %v1140_v9 = vand.u32 2147483648, %v1001_v28  ;;  %v1138_v57 = vand.u32 2147483647, %v1001_v28 }
 0x1c0   : > { %v1258_v52 = vsel %vm2337_vm4, %v1112_v50, %v2362_v47  ;;  %v1116_v53 = vsub.f32 1.0, %v1115_v49  ;;  %v2394_v54 = vadd.f32 %v2321_v34, %v928_v51  ;;  %vm1134_vm6 = vweird.f32 %v1001_v28 }
 0x1c1   : > { %1274 = vst [vmem:[%s2346_s28 + $0x30] sm:$0xff] %v1258_v52  ;;  %v1141_v17 = vor.u32 1.1754944e-38, %v1140_v9  ;;  %vm1139_vm8 = vcmp.eq.f32.partialorder %v1138_v57, 8.507059e+37 }
 0x1c2   : > { %v1117_v56 = vmul.f32 %v1854_v44, %v1116_v53  ;;  %v955_v58 = vsub.f32 0.0, %v2394_v54 }
 0x1c4   : > { %v1856_v59 = vpop.eup %1855  ;;  %v1118_v60 = vadd.f32 %v1854_v44, %v1117_v56  ;;  %v981_v61 = vmul.f32 1.442695, %v955_v58 }
 0x1c5   : > { %v1858_v62 = vpop.eup %1857  ;;  %v1002_v47 = vadd.f32 1.0, %v1856_v59 }
 0x1c6   : > { %v1122_v2 = vsel %vm1121_vm2, %v1854_v44, %v1118_v60  ;;  %v1130_v3 = vmul.f32 %v1858_v62, %v1001_v28  ;;  %1859 = vpow2.f32 %v981_v61  ;;  %vm1135_vm5 = vweird.f32 %v1858_v62 }
 0x1c7   : > { %v1127_v4 = vsel %vm1124_vm3, %v1126_v63, %v1122_v2  ;;  %1861 = vrcp.f32 %v1002_v47  ;;  %v930_v5 = vpop.f32.mrf.mxu3  ;;  %vm1136_vm7 = vmor %vm1134_vm6, %vm1135_vm5  ;;  %v1155_v26 = vand.u32 2147483648, %v1002_v47  ;;  %v1153_v11 = vand.u32 2147483647, %v1002_v47 }
 0x1c8   : > { %v1259_v6 = vsel %vm2337_vm4, %v1127_v4, %v2370_v1  ;;  %v1131_v7 = vsub.f32 1.0, %v1130_v3  ;;  %v2402_v8 = vadd.f32 %v2321_v34, %v930_v5  ;;  %vm1149_vm10 = vweird.f32 %v1002_v47 }
 0x1c9   : > { %1275 = vst [vmem:[%s2346_s28 + $0x38] sm:$0xff] %v1259_v6  ;;  %v1156_v35 = vor.u32 1.1754944e-38, %v1155_v26  ;;  %vm1154_vm12 = vcmp.eq.f32.partialorder %v1153_v11, 8.507059e+37 }
 0x1ca   : > { %v1132_v10 = vmul.f32 %v1858_v62, %v1131_v7  ;;  %v956_v12 = vsub.f32 0.0, %v2402_v8 }
 0x1cc   : > { %v1860_v13 = vpop.eup %1859  ;;  %v1133_v14 = vadd.f32 %v1858_v62, %v1132_v10  ;;  %v983_v15 = vmul.f32 1.442695, %v956_v12 }
 0x1cd   : > { %v1862_v16 = vpop.eup %1861  ;;  %v1003_v1 = vadd.f32 1.0, %v1860_v13 }
 0x1ce   : > { %v1137_v19 = vsel %vm1136_vm7, %v1858_v62, %v1133_v14  ;;  %v1145_v20 = vmul.f32 %v1862_v16, %v1002_v47  ;;  %1863 = vpow2.f32 %v983_v15  ;;  %vm1150_vm9 = vweird.f32 %v1862_v16 }
 0x1cf   : > { %v1142_v21 = vsel %vm1139_vm8, %v1141_v17, %v1137_v19  ;;  %1865 = vrcp.f32 %v1003_v1  ;;  %v933_v22 = vpop.f32.mrf.mxu3  ;;  %vm1151_vm11 = vmor %vm1149_vm10, %vm1150_vm9  ;;  %v1170_v44 = vand.u32 2147483648, %v1003_v1  ;;  %v1168_v28 = vand.u32 2147483647, %v1003_v1 }
 0x1d0   : > { %v1260_v23 = vsel %vm2337_vm4, %v1142_v21, %v2378_v18  ;;  %v1146_v24 = vsub.f32 1.0, %v1145_v20  ;;  %v2410_v25 = vadd.f32 %v2321_v34, %v933_v22  ;;  %vm1164_vm14 = vweird.f32 %v1003_v1 }
 0x1d1   : > { %1276 = vst [vmem:[%s2346_s28 + $0x40] sm:$0xff] %v1260_v23  ;;  %v1171_v53 = vor.u32 1.1754944e-38, %v1170_v44  ;;  %vm1169_vm0 = vcmp.eq.f32.partialorder %v1168_v28, 8.507059e+37 }
 0x1d2   : > { %v1147_v27 = vmul.f32 %v1862_v16, %v1146_v24  ;;  %v957_v29 = vsub.f32 0.0, %v2410_v25 }
 0x1d4   : > { %v1864_v30 = vpop.eup %1863  ;;  %v1148_v31 = vadd.f32 %v1862_v16, %v1147_v27  ;;  %v985_v32 = vmul.f32 1.442695, %v957_v29 }
 0x1d5   : > { %v1866_v33 = vpop.eup %1865  ;;  %v1004_v18 = vadd.f32 1.0, %v1864_v30 }
 0x1d6   : > { %v1152_v37 = vsel %vm1151_vm11, %v1862_v16, %v1148_v31  ;;  %v1160_v38 = vmul.f32 %v1866_v33, %v1003_v1  ;;  %1867 = vpow2.f32 %v985_v32  ;;  %vm1165_vm13 = vweird.f32 %v1866_v33 }
 0x1d7   : > { %v1157_v42 = vsel %vm1154_vm12, %v1156_v35, %v1152_v37  ;;  %1869 = vrcp.f32 %v1004_v18  ;;  %v935_v39 = vpop.f32.mrf.mxu3  ;;  %vm1166_vm15 = vmor %vm1164_vm14, %vm1165_vm13  ;;  %v1185_v62 = vand.u32 2147483648, %v1004_v18  ;;  %v1183_v47 = vand.u32 2147483647, %v1004_v18 }
 0x1d8   : > { %v1261_v40 = vsel %vm2337_vm4, %v1157_v42, %v2386_v36  ;;  %v1161_v41 = vsub.f32 1.0, %v1160_v38  ;;  %v2418_v43 = vadd.f32 %v2321_v34, %v935_v39  ;;  %vm1179_vm2 = vweird.f32 %v1004_v18 }
 0x1d9   : > { %1277 = vst [vmem:[%s2346_s28 + $0x48] sm:$0xff] %v1261_v40  ;;  %v1186_v7 = vor.u32 1.1754944e-38, %v1185_v62  ;;  %vm1184_vm5 = vcmp.eq.f32.partialorder %v1183_v47, 8.507059e+37 }
 0x1da   : > { %v1162_v45 = vmul.f32 %v1866_v33, %v1161_v41  ;;  %v958_v48 = vsub.f32 0.0, %v2418_v43 }
 0x1dc   : > { %v1868_v49 = vpop.eup %1867  ;;  %v1163_v50 = vadd.f32 %v1866_v33, %v1162_v45  ;;  %v987_v51 = vmul.f32 1.442695, %v958_v48 }
 0x1dd   : > { %v1870_v52 = vpop.eup %1869  ;;  %v1005_v36 = vadd.f32 1.0, %v1868_v49 }
 0x1de   : > { %v1167_v55 = vsel %vm1166_vm15, %v1866_v33, %v1163_v50  ;;  %v1175_v56 = vmul.f32 %v1870_v52, %v1004_v18  ;;  %1871 = vpow2.f32 %v987_v51  ;;  %vm1180_vm1 = vweird.f32 %v1870_v52 }
 0x1df   : > { %v1172_v46 = vsel %vm1169_vm0, %v1171_v53, %v1167_v55  ;;  %1873 = vrcp.f32 %v1005_v36  ;;  %v938_v58 = vpop.f32.mrf.mxu3  ;;  %vm1181_vm3 = vmor %vm1179_vm2, %vm1180_vm1  ;;  %v1200_v16 = vand.u32 2147483648, %v1005_v36  ;;  %v1198_v1 = vand.u32 2147483647, %v1005_v36 }
 0x1e0   : > { %v1262_v59 = vsel %vm2337_vm4, %v1172_v46, %v2394_v54  ;;  %v1176_v60 = vsub.f32 1.0, %v1175_v56  ;;  %v2426_v61 = vadd.f32 %v2321_v34, %v938_v58  ;;  %vm1194_vm7 = vweird.f32 %v1005_v36 }
 0x1e1   : > { %1278 = vst [vmem:[%s2346_s28 + $0x50] sm:$0xff] %v1262_v59  ;;  %v1201_v24 = vor.u32 1.1754944e-38, %v1200_v16  ;;  %vm1199_vm9 = vcmp.eq.f32.partialorder %v1198_v1, 8.507059e+37 }
 0x1e2   : > { %v1177_v63 = vmul.f32 %v1870_v52, %v1176_v60  ;;  %v959_v2 = vsub.f32 0.0, %v2426_v61 }
 0x1e4   : > { %v1872_v3 = vpop.eup %1871  ;;  %v1178_v4 = vadd.f32 %v1870_v52, %v1177_v63  ;;  %v989_v5 = vmul.f32 1.442695, %v959_v2 }
 0x1e5   : > { %v1874_v6 = vpop.eup %1873  ;;  %v1006_v54 = vadd.f32 1.0, %v1872_v3 }
 0x1e6   : > { %v1182_v9 = vsel %vm1181_vm3, %v1870_v52, %v1178_v4  ;;  %v1190_v10 = vmul.f32 %v1874_v6, %v1005_v36  ;;  %1875 = vpow2.f32 %v989_v5  ;;  %vm1195_vm6 = vweird.f32 %v1874_v6 }
 0x1e7   : > { %v1187_v57 = vsel %vm1184_vm5, %v1186_v7, %v1182_v9  ;;  %1877 = vrcp.f32 %v1006_v54  ;;  %v940_v12 = vpop.f32.mrf.mxu3  ;;  %vm1196_vm8 = vmor %vm1194_vm7, %vm1195_vm6  ;;  %v1215_v30 = vand.u32 2147483648, %v1006_v54  ;;  %v1213_v32 = vand.u32 2147483647, %v1006_v54 }
 0x1e8   : > { %v1263_v13 = vsel %vm2337_vm4, %v1187_v57, %v2402_v8  ;;  %v1191_v14 = vsub.f32 1.0, %v1190_v10  ;;  %v2434_v15 = vadd.f32 %v2321_v34, %v940_v12  ;;  %vm1209_vm11 = vweird.f32 %v1006_v54 }
 0x1e9   : > { %1279 = vst [vmem:[%s2346_s28 + $0x58] sm:$0xff] %v1263_v13  ;;  %v1216_v37 = vor.u32 1.1754944e-38, %v1215_v30  ;;  %vm1214_vm13 = vcmp.eq.f32.partialorder %v1213_v32, 8.507059e+37 }
 0x1ea   : > { %v1192_v17 = vmul.f32 %v1874_v6, %v1191_v14  ;;  %v960_v19 = vsub.f32 0.0, %v2434_v15 }
 0x1ec   : > { %v1876_v20 = vpop.eup %1875  ;;  %v1193_v21 = vadd.f32 %v1874_v6, %v1192_v17  ;;  %v991_v22 = vmul.f32 1.442695, %v960_v19 }
 0x1ed   : > { %v1878_v23 = vpop.eup %1877  ;;  %v1007_v8 = vadd.f32 1.0, %v1876_v20 }
 0x1ee   : > { %v1197_v26 = vsel %vm1196_vm8, %v1874_v6, %v1193_v21  ;;  %v1205_v34 = vmul.f32 %v1878_v23, %v1006_v54  ;;  %1879 = vpow2.f32 %v991_v22  ;;  %vm1210_vm10 = vweird.f32 %v1878_v23 }
 0x1ef   : > { %v1202_v27 = vsel %vm1199_vm9, %v1201_v24, %v1197_v26  ;;  %1881 = vrcp.f32 %v1007_v8  ;;  %vm1211_vm12 = vmor %vm1209_vm11, %vm1210_vm10  ;;  %v1230_v44 = vand.u32 2147483648, %v1007_v8  ;;  %v1228_v28 = vand.u32 2147483647, %v1007_v8 }
 0x1f0   : > { %v1264_v11 = vsel %vm2337_vm4, %v1202_v27, %v2410_v25  ;;  %v1206_v29 = vsub.f32 1.0, %v1205_v34  ;;  %vm1224_vm15 = vweird.f32 %v1007_v8 }
 0x1f1   : > { %1280 = vst [vmem:[%s2346_s28 + $0x60] sm:$0xff] %v1264_v11  ;;  %v1231_v50 = vor.u32 1.1754944e-38, %v1230_v44  ;;  %vm1229_vm1 = vcmp.eq.f32.partialorder %v1228_v28, 8.507059e+37 }
 0x1f2   : > { %v1207_v31 = vmul.f32 %v1878_v23, %v1206_v29 }
 0x1f4   : > { %v1880_v33 = vpop.eup %1879  ;;  %v1208_v35 = vadd.f32 %v1878_v23, %v1207_v31 }
 0x1f5   : > { %v1882_v18 = vpop.eup %1881  ;;  %v1008_v38 = vadd.f32 1.0, %v1880_v33 }
 0x1f6   : > { %v1212_v42 = vsel %vm1211_vm12, %v1878_v23, %v1208_v35  ;;  %v1220_v39 = vmul.f32 %v1882_v18, %v1007_v8  ;;  %vm1225_vm14 = vweird.f32 %v1882_v18 }
 0x1f7   : > { %v1217_v25 = vsel %vm1214_vm13, %v1216_v37, %v1212_v42  ;;  %1883 = vrcp.f32 %v1008_v38  ;;  %vm1226_vm0 = vmor %vm1224_vm15, %vm1225_vm14  ;;  %v1245_v55 = vand.u32 2147483648, %v1008_v38  ;;  %v1243_v46 = vand.u32 2147483647, %v1008_v38 }
 0x1f8   : > { %v1265_v40 = vsel %vm2337_vm4, %v1217_v25, %v2418_v43  ;;  %v1221_v41 = vsub.f32 1.0, %v1220_v39  ;;  %vm1239_vm3 = vweird.f32 %v1008_v38 }
 0x1f9   : > { %1281 = vst [vmem:[%s2346_s28 + $0x68] sm:$0xff] %v1265_v40  ;;  %v1246_v59 = vor.u32 1.1754944e-38, %v1245_v55  ;;  %vm1244_vm6 = vcmp.eq.f32.partialorder %v1243_v46, 8.507059e+37 }
 0x1fa   : > { %v1222_v45 = vmul.f32 %v1882_v18, %v1221_v41 }
 0x1fc   : > { %v1223_v48 = vadd.f32 %v1882_v18, %v1222_v45 }
 0x1fd   : > { %v1884_v49 = vpop.eup %1883 }
 0x1fe   : > { %v1227_v51 = vsel %vm1226_vm0, %v1882_v18, %v1223_v48  ;;  %v1235_v52 = vmul.f32 %v1884_v49, %v1008_v38  ;;  %vm1240_vm2 = vweird.f32 %v1884_v49 }
 0x1ff   : > { %v1232_v53 = vsel %vm1229_vm1, %v1231_v50, %v1227_v51  ;;  %vm1241_vm5 = vmor %vm1239_vm3, %vm1240_vm2 }
 0x200   : > { %v1266_v43 = vsel %vm2337_vm4, %v1232_v53, %v2426_v61  ;;  %v1236_v36 = vsub.f32 1.0, %v1235_v52 }
 0x201   : > { %1282 = vst [vmem:[%s2346_s28 + $0x70] sm:$0xff] %v1266_v43 }
 0x202   : > { %v1237_v56 = vmul.f32 %v1884_v49, %v1236_v36 }
 0x204   : > { %v1238_v58 = vadd.f32 %v1884_v49, %v1237_v56 }
 0x206   : > { %v1242_v60 = vsel %vm1241_vm5, %v1884_v49, %v1238_v58 }
 0x207   : > { %v1247_v61 = vsel %vm1244_vm6, %v1246_v59, %v1242_v60 }
 0x208   : > { %v1267_v62 = vsel %vm2337_vm4, %v1247_v61, %v2434_v15 }
 0x209   : > { %1283 = vst [vmem:[%s2346_s28 + $0x78] sm:$0xff] %v1267_v62 }
 0x20a   : > { %2002 = shalt.err (!%p1999_p13)
}
 0x20b   : > { %s2085_s1 = smov 128   ;;  %s2086_s18 = smov 8  }
 0x20c   : > { %1724 = dma.vmem_to_hbm [thread:$0]  (%p2212_p5), %s1300_s15, 2048, %s1302_s16, %s1285_s26, %s2085_s1, %s2085_s1, %s2086_s18  }
 0x20d PF: > { %s2538_s23 = sld [smem:[#allocation14_spill]] }
 0x20e   : > { %s2539_s25 = sld [smem:[#allocation12_spill]] }
 0x213   : > { %p1746_p0 = scmp.ge.s32.totalorder %s2538_s23, 2 }
 0x214   : > { %s1316_s30 = sand.u32 1, %s2539_s25  }
 0x215   : > { %p1738_p3 = pnand %p1746_p0, %p2176_p6  ;;  %s1317_s6 = scalar_lea.sflag [#allocation4], %s1316_s30 }
 0x217   : > { %p1739_p7 = pneg %p1738_p3 }
 0x219   : > { %2044 = dma.done.wait (%p1739_p7), %s1317_s6, 2048  }
 0x21a   : > { %2046 = vsyncadd (%p1739_p7), %s1317_s6, 4294965248  ;;  %s22_s25 = sadd.s32 1, %s2538_s23   ;;  %s2541_s21 = sld [smem:[#allocation13_spill]] }
 0x21b   : > { %p19_p9 = scmp.ge.s32.totalorder %s22_s25, 6   ;;  %s2542_s23 = sld [smem:[#allocation16_spill]] }
 0x21c   : > { %s2543_s10 = sld [smem:[#allocation18_spill]]  ;;  %s2544_s18 = smov %s2053_s19 }
 0x21d   : > { %s2545_s19 = smov %s2057_s20  ;;  %s2546_s20 = smov %s2227_s29 }
 0x21e   : > { %s2547_s22 = smov %s2073_s24  ;;  %21 = sbr.rel (!%p19_p9) target bundleno = 12 (0xc), region = 93 }
 0x222   : > { %s2548_s24 = smov %s2543_s10 }
 0x223   :  { %1323 = vsyncpa [#allocation3], 1 }
 0x224   :  { %1325 = vsyncpa [#allocation3 + $0x1], 1 }
 0x225   :  { %1326 = vsyncpa [#allocation6], 1 }
 0x226   :  { %1327 = vsyncpa [#allocation4], 1 }
 0x227   :  { %1329 = vsyncpa [#allocation4 + $0x1], 1 }

</bundles_post_ra>
